<compile_context>
chip_gen: v7x
topology: tpu7x:2x2x1
jax: 0.10.0
libtpu: 0.0.40
codegen_flags: <defaults>
</compile_context>

<pallas_src>
import math

import jax
import jax.numpy as jnp
from jax.experimental import pallas as pl
from jax.experimental.pallas import tpu as pltpu


def _round_up(x, n):
    return ((x + n - 1) // n) * n


def _itemsize(dtype):
    return jnp.dtype(dtype).itemsize


def _vmem_capacity_bytes():
    """Per-core VMEM capacity; conservative default if the query is unavailable."""
    try:
        return int(pltpu.get_tpu_info().vmem_capacity_bytes)
    except Exception:
        return 64 * 1024 * 1024  # v7x per-TC size: safe lower bound everywhere


# --------------------------------------------------------------------------- #
# Fused whole-MLP kernel: all (padded) weights stay resident in VMEM.
# --------------------------------------------------------------------------- #
def _make_fused_kernel(num_layers):
    """Kernel signature: (x_ref, w0, b0, w1, b1, ..., o_ref)."""

    def kernel(*refs):
        x_ref = refs[0]
        o_ref = refs[-1]
        params = refs[1:-1]

        # Cast to bf16 in-kernel (VPU cast hides under the MXU); no wrapper pass.
        h = x_ref[...].astype(jnp.bfloat16)
        for i in range(num_layers):
            w_ref = params[2 * i]
            b_ref = params[2 * i + 1]
            # MXU matmul: bf16 x bf16 operands, f32 accumulation.
            acc = jnp.dot(h, w_ref[...], preferred_element_type=jnp.float32)
            acc = acc + b_ref[...]            # (1, out) broadcasts over rows (f32)
            if i < num_layers - 1:
                h = jnp.maximum(acc, 0.0).astype(jnp.bfloat16)   # ReLU, re-pack
            else:
                o_ref[...] = acc.astype(o_ref.dtype)

    return kernel


# --------------------------------------------------------------------------- #
# Fallback: one tiled matmul kernel per layer (used when the resident-weight
# fused kernel would overflow VMEM, e.g. very large hidden dims on v7x).
# --------------------------------------------------------------------------- #
def _make_linear_kernel(apply_relu):
    def kernel(x_ref, w_ref, b_ref, o_ref, acc_ref):
        @pl.when(pl.program_id(2) == 0)
        def _():
            acc_ref[...] = jnp.zeros_like(acc_ref)

        acc_ref[...] += jnp.dot(
            x_ref[...].astype(jnp.bfloat16), w_ref[...],
            preferred_element_type=jnp.float32)

        @pl.when(pl.program_id(2) == pl.num_programs(2) - 1)
        def _():
            acc = acc_ref[...] + b_ref[...]
            if apply_relu:
                acc = jnp.maximum(acc, 0.0)
            o_ref[...] = acc.astype(o_ref.dtype)

    return kernel


def _divisible_tile(dim, target):
    """Largest multiple of 128 that divides `dim` (a 128-multiple) and <= target."""
    t = max(128, (min(dim, target) // 128) * 128)
    while dim % t:
        t -= 128
    return t


def _linear_pallas(x2d, w, b, apply_relu, out_dtype, *, tm, vmem_limit):
    m, kdim = x2d.shape
    ndim = w.shape[1]
    tk = _divisible_tile(kdim, 512)   # K tiles must divide (reduction axis)
    tn = _divisible_tile(ndim, 512)
    grid = (pl.cdiv(m, tm), ndim // tn, kdim // tk)

    cost = pl.CostEstimate(
        flops=2 * m * kdim * ndim,
        transcendentals=0,
        bytes_accessed=int(m * kdim * _itemsize(x2d.dtype) + w.size * 2
                           + b.size * 4 + m * ndim * _itemsize(out_dtype)),
    )
    return pl.pallas_call(
        _make_linear_kernel(apply_relu),
        out_shape=jax.ShapeDtypeStruct((m, ndim), out_dtype),
        grid_spec=pltpu.PrefetchScalarGridSpec(
            num_scalar_prefetch=0,
            grid=grid,
            in_specs=[
                pl.BlockSpec((tm, tk), lambda i, j, k: (i, k)),
                pl.BlockSpec((tk, tn), lambda i, j, k: (k, j)),
                pl.BlockSpec((1, tn), lambda i, j, k: (0, j)),
            ],
            out_specs=pl.BlockSpec((tm, tn), lambda i, j, k: (i, j)),
            scratch_shapes=[pltpu.VMEM((tm, tn), jnp.float32)],
        ),
        compiler_params=pltpu.CompilerParams(
            dimension_semantics=("parallel", "parallel", "arbitrary"),
            vmem_limit_bytes=vmem_limit,
        ),
        cost_estimate=cost,
    )(x2d, w, b)


# --------------------------------------------------------------------------- #
# Wrapper
# --------------------------------------------------------------------------- #
def mlp_pallas(x, weights, biases, *, row_tile=1024, lane_multiple=128,
               force_layerwise=False):
    """Run the MLP as Pallas TPU kernels.

    x       : (..., input_dim) array.
    weights : list of (in_dim, out_dim) arrays (transposed vs. torch).
    biases  : list of (out_dim,) arrays.
    """
    num_layers = len(weights)
    assert len(biases) == num_layers

    in_dim = weights[0].shape[0]
    out_dim = weights[-1].shape[1]
    lead_shape = x.shape[:-1]
    m = math.prod(lead_shape) if lead_shape else 1

    # ---- generation-aware VMEM economics ------------------------------------
    vmem_cap = _vmem_capacity_bytes()
    vmem_limit = int(vmem_cap * 0.85)    # leave headroom for Pallas internals
    vmem_budget = int(vmem_cap * 0.70)   # what our own estimate may consume

    # ---- lane-dense padding of every feature dim (multiples of 128) ---------
    # TODO(synk): measure padding K/N to 256-multiples on v6e/v7x (256x256 MXU).
    dims = [in_dim] + [w.shape[1] for w in weights]
    dims_p = [_round_up(d, lane_multiple) for d in dims]

    w_p, b_p = [], []
    for i, (w, b) in enumerate(zip(weights, biases)):
        wp = jnp.pad(
            w.astype(jnp.bfloat16),
            ((0, dims_p[i] - w.shape[0]), (0, dims_p[i + 1] - w.shape[1])),
        )
        bp = jnp.pad(b.astype(jnp.float32), (0, dims_p[i + 1] - b.shape[0]))
        w_p.append(wp)
        b_p.append(bp.reshape(1, -1))

    # x stays in its native dtype (cast to bf16 in-kernel); only the feature (K)
    # dim is zero-padded -- and only when it is not already 128-aligned. No M pad.
    x2d = x.reshape(m, in_dim)
    if dims_p[0] != in_dim:
        x2d = jnp.pad(x2d, ((0, 0), (0, dims_p[0] - in_dim)))

    x_isz = _itemsize(x.dtype)
    out_isz = _itemsize(x.dtype)
    max_dp = max(dims_p)

    def vmem_estimate(tm_, wbuf):
        nbytes = 2 * tm_ * dims_p[0] * x_isz       # x blocks (double-buffered)
        nbytes += 2 * tm_ * dims_p[-1] * out_isz   # out blocks (double-buffered)
        nbytes += tm_ * max_dp * 2                 # live bf16 h
        nbytes += tm_ * max_dp * 4                 # live f32 acc
        nbytes += tm_ * max_dp * 2                 # re-cast bf16 for next layer
        for i in range(num_layers):
            nbytes += wbuf * dims_p[i] * dims_p[i + 1] * 2   # bf16 weights
            nbytes += wbuf * dims_p[i + 1] * 4               # f32 biases
        return int(nbytes * 1.15)                  # compiler scratch / spill headroom

    # ---- row tile: big, multiple of 16 (bf16 sublane pack), >= 2 grid steps --
    tm = min(row_tile, _round_up(m, 16))
    if m >= 32:
        # Ensure the parallel row grid has at least 2 steps so a 2-TC chip (v7x)
        # can split the work; on 1-TC chips the extra step is ~0.35 us.
        tm = min(tm, _round_up(-(-m // 2), 16))
    while vmem_estimate(tm, wbuf=1) > vmem_budget and tm > 16:
        tm = max(16, _round_up(tm // 2, 16))

    fused_fits = (not force_layerwise) and vmem_estimate(tm, wbuf=1) <= vmem_budget

    def run_fused(weight_buffers):
        grid = (pl.cdiv(m, tm),)
        spec_kwargs = {}
        if weight_buffers is not None:
            # Grid-invariant weights/biases: double-buffering them is pure waste.
            spec_kwargs["pipeline_mode"] = pl.Buffered(weight_buffers)

        in_specs = [pl.BlockSpec((tm, dims_p[0]), lambda i: (i, 0))]
        for wp, bp in zip(w_p, b_p):
            in_specs.append(pl.BlockSpec(wp.shape, lambda i: (0, 0), **spec_kwargs))
            in_specs.append(pl.BlockSpec(bp.shape, lambda i: (0, 0), **spec_kwargs))
        out_spec = pl.BlockSpec((tm, dims_p[-1]), lambda i: (i, 0))

        cost = pl.CostEstimate(
            flops=2 * m * sum(dims_p[i] * dims_p[i + 1] for i in range(num_layers)),
            transcendentals=0,
            bytes_accessed=int(m * dims_p[0] * x_isz + m * dims_p[-1] * out_isz
                               + sum(w.size * 2 for w in w_p)
                               + sum(bb.size * 4 for bb in b_p)),
        )
        args = [x2d]
        for wp, bp in zip(w_p, b_p):
            args += [wp, bp]
        y = pl.pallas_call(
            _make_fused_kernel(num_layers),
            out_shape=jax.ShapeDtypeStruct((m, dims_p[-1]), x.dtype),
            grid_spec=pltpu.PrefetchScalarGridSpec(
                num_scalar_prefetch=0,
                grid=grid,
                in_specs=in_specs,
                out_specs=out_spec,
            ),
            compiler_params=pltpu.CompilerParams(
                dimension_semantics=("parallel",),
                vmem_limit_bytes=vmem_limit,
            ),
            cost_estimate=cost,
        )(*args)
        return jax.block_until_ready(y)

    def run_layerwise():
        tm_l = min(256, _round_up(m, 16))
        h = x2d
        for i in range(num_layers):
            relu = i < num_layers - 1
            out_dt = jnp.bfloat16 if relu else x.dtype   # bf16 hidden slabs
            h = _linear_pallas(h, w_p[i], b_p[i], relu, out_dt,
                               tm=tm_l, vmem_limit=vmem_limit)
        return jax.block_until_ready(h)

    y_p = None
    if fused_fits:
        for buffers in (1, None):   # prefer single-buffered resident weights
            try:
                y_p = run_fused(buffers)
                break
            except Exception:
                # pipeline_mode=pl.Buffered(1) not supported by this jax build,
                # or the compiler still ran out of VMEM: try the next option.
                y_p = None
    if y_p is None:
        # Resident-weight fused kernel does not fit / compile: per-layer tiled
        # matmuls with an M/N/K grid (keeps a large row tile, weights streamed).
        y_p = run_layerwise()

    y = y_p[:, :out_dim]
    return y.reshape(*lead_shape, out_dim)


# --------------------------------------------------------------------------- #
# Params / reference
# --------------------------------------------------------------------------- #
def init_mlp_params(key, input_dim, hidden_dim, output_dim, num_layers):
    """Deterministic synthetic init matching nn.Linear shapes.

    PyTorch stores weight as (out, in); we store the transposed (in, out)
    form so that y = x @ W + b.
    """
    h = [hidden_dim] * (num_layers - 1)
    dims_in = [input_dim] + h
    dims_out = h + [output_dim]

    weights, biases = [], []
    for n, k_out in zip(dims_in, dims_out):
        key, kw, kb = jax.random.split(key, 3)
        bound = 1.0 / jnp.sqrt(jnp.float32(n))  # same scale as PyTorch default
        w = jax.random.uniform(kw, (n, k_out), jnp.float32, -bound, bound)
        b = jax.random.uniform(kb, (k_out,), jnp.float32, -bound, bound)
        weights.append(w)
        biases.append(b)
    return weights, biases


def mlp_ref(x, weights, biases, matmul_dtype=None):
    """Plain-JAX reference. If matmul_dtype=bf16, mirrors the kernel's rounding."""
    num_layers = len(weights)
    h = x
    for i, (w, b) in enumerate(zip(weights, biases)):
        if matmul_dtype is not None:
            hm = h.astype(matmul_dtype).astype(jnp.float32)
            wm = w.astype(matmul_dtype).astype(jnp.float32)
        else:
            hm, wm = h, w
        h = hm @ wm + b
        if i < num_layers - 1:
            h = jnp.maximum(h, 0.0)
    return h


if __name__ == "__main__":
    # Shapes consistent with DETR-style MLP usage: x is (batch, num_queries, input_dim).
    batch, seq = 2, 8
    input_dim, hidden_dim, output_dim, num_layers = 32, 32, 4, 3

    key = jax.random.PRNGKey(0)
    key, kx = jax.random.split(key)
    x = jax.random.normal(kx, (batch, seq, input_dim), jnp.float32)

    weights, biases = init_mlp_params(
        key, input_dim, hidden_dim, output_dim, num_layers
    )

    y = jax.block_until_ready(mlp_pallas(x, weights, biases))
    assert y.shape == (batch, seq, output_dim), y.shape

    # Reference with the kernel's bf16-operand rounding (tight tolerance).
    y_bf16_ref = mlp_ref(x, weights, biases, matmul_dtype=jnp.bfloat16)
    assert jnp.allclose(y, y_bf16_ref, atol=5e-3, rtol=5e-3), (
        float(jnp.max(jnp.abs(y - y_bf16_ref)))
    )

    # Loose sanity check vs. the pure-f32 reference (bf16 operand drift only).
    y_f32_ref = mlp_ref(x, weights, biases)
    assert jnp.allclose(y, y_f32_ref, atol=5e-2, rtol=5e-2), (
        float(jnp.max(jnp.abs(y - y_f32_ref)))
    )

    # Also exercise the layer-wise (streamed-weight) fallback path and check it.
    y_lw = jax.block_until_ready(mlp_pallas(x, weights, biases, force_layerwise=True))
    assert y_lw.shape == (batch, seq, output_dim), y_lw.shape
    assert jnp.allclose(y_lw, y_bf16_ref, atol=5e-3, rtol=5e-3), (
        float(jnp.max(jnp.abs(y_lw - y_bf16_ref)))
    )

    print("KERNEL_OK")
</pallas_src>

<mosaic_0001>
module attributes {stable_mosaic.version = 11 : i64} {
  func.func @kernel(%arg0: i32, %arg1: memref<16x128xf32, #tpu.memory_space<vmem>>, %arg2: memref<128x128xbf16, #tpu.memory_space<vmem>>, %arg3: memref<1x128xf32, #tpu.memory_space<vmem>>, %arg4: memref<128x128xbf16, #tpu.memory_space<vmem>>, %arg5: memref<1x128xf32, #tpu.memory_space<vmem>>, %arg6: memref<128x128xbf16, #tpu.memory_space<vmem>>, %arg7: memref<1x128xf32, #tpu.memory_space<vmem>>, %arg8: memref<16x128xf32, #tpu.memory_space<vmem>>) attributes {dimension_semantics = [#tpu.dimension_semantics<parallel>], iteration_bounds = array<i64: 1>, scalar_prefetch = 0 : i64, scratch_operands = 0 : i64, tpu.core_type = #tpu.core_type<tc>, window_params = [{transform_indices = @transform_0, window_bounds = array<i64: 16, 128>}, {pipeline_mode = #tpu.pipeline_mode<synchronous>, transform_indices = @transform_1, window_bounds = array<i64: 128, 128>}, {pipeline_mode = #tpu.pipeline_mode<synchronous>, transform_indices = @transform_2, window_bounds = array<i64: 1, 128>}, {pipeline_mode = #tpu.pipeline_mode<synchronous>, transform_indices = @transform_3, window_bounds = array<i64: 128, 128>}, {pipeline_mode = #tpu.pipeline_mode<synchronous>, transform_indices = @transform_4, window_bounds = array<i64: 1, 128>}, {pipeline_mode = #tpu.pipeline_mode<synchronous>, transform_indices = @transform_5, window_bounds = array<i64: 128, 128>}, {pipeline_mode = #tpu.pipeline_mode<synchronous>, transform_indices = @transform_6, window_bounds = array<i64: 1, 128>}, {transform_indices = @transform_7, window_bounds = array<i64: 16, 128>}]} {
    %c0 = arith.constant 0 : index
    %c0_0 = arith.constant 0 : index
    %0 = vector.load %arg1[%c0, %c0_0] : memref<16x128xf32, #tpu.memory_space<vmem>>, vector<16x128xf32>
    %1 = arith.truncf %0 : vector<16x128xf32> to vector<16x128xbf16>
    %c0_1 = arith.constant 0 : index
    %c0_2 = arith.constant 0 : index
    %2 = vector.load %arg2[%c0_1, %c0_2] : memref<128x128xbf16, #tpu.memory_space<vmem>>, vector<128x128xbf16>
    %cst = arith.constant dense<0.000000e+00> : vector<16x128xf32>
    %3 = tpu.matmul %1, %2, %cst {dimension_numbers = #tpu.dot_dimension_numbers<[1], [0], [0], [1], [0, 0, 1, 1], [], []>} : vector<16x128xbf16>, vector<128x128xbf16>, vector<16x128xf32> -> vector<16x128xf32>
    %c0_3 = arith.constant 0 : index
    %c0_4 = arith.constant 0 : index
    %4 = vector.load %arg3[%c0_3, %c0_4] : memref<1x128xf32, #tpu.memory_space<vmem>>, vector<1x128xf32>
    %5 = vector.broadcast %4 : vector<1x128xf32> to vector<16x128xf32>
    %6 = arith.addf %3, %5 : vector<16x128xf32>
    %cst_5 = arith.constant 0.000000e+00 : f32
    %7 = vector.broadcast %cst_5 : f32 to vector<16x128xf32>
    %8 = arith.maximumf %6, %7 : vector<16x128xf32>
    %9 = arith.truncf %8 : vector<16x128xf32> to vector<16x128xbf16>
    %c0_6 = arith.constant 0 : index
    %c0_7 = arith.constant 0 : index
    %10 = vector.load %arg4[%c0_6, %c0_7] : memref<128x128xbf16, #tpu.memory_space<vmem>>, vector<128x128xbf16>
    %cst_8 = arith.constant dense<0.000000e+00> : vector<16x128xf32>
    %11 = tpu.matmul %9, %10, %cst_8 {dimension_numbers = #tpu.dot_dimension_numbers<[1], [0], [0], [1], [0, 0, 1, 1], [], []>} : vector<16x128xbf16>, vector<128x128xbf16>, vector<16x128xf32> -> vector<16x128xf32>
    %c0_9 = arith.constant 0 : index
    %c0_10 = arith.constant 0 : index
    %12 = vector.load %arg5[%c0_9, %c0_10] : memref<1x128xf32, #tpu.memory_space<vmem>>, vector<1x128xf32>
    %13 = vector.broadcast %12 : vector<1x128xf32> to vector<16x128xf32>
    %14 = arith.addf %11, %13 : vector<16x128xf32>
    %cst_11 = arith.constant 0.000000e+00 : f32
    %15 = vector.broadcast %cst_11 : f32 to vector<16x128xf32>
    %16 = arith.maximumf %14, %15 : vector<16x128xf32>
    %17 = arith.truncf %16 : vector<16x128xf32> to vector<16x128xbf16>
    %c0_12 = arith.constant 0 : index
    %c0_13 = arith.constant 0 : index
    %18 = vector.load %arg6[%c0_12, %c0_13] : memref<128x128xbf16, #tpu.memory_space<vmem>>, vector<128x128xbf16>
    %cst_14 = arith.constant dense<0.000000e+00> : vector<16x128xf32>
    %19 = tpu.matmul %17, %18, %cst_14 {dimension_numbers = #tpu.dot_dimension_numbers<[1], [0], [0], [1], [0, 0, 1, 1], [], []>} : vector<16x128xbf16>, vector<128x128xbf16>, vector<16x128xf32> -> vector<16x128xf32>
    %c0_15 = arith.constant 0 : index
    %c0_16 = arith.constant 0 : index
    %20 = vector.load %arg7[%c0_15, %c0_16] : memref<1x128xf32, #tpu.memory_space<vmem>>, vector<1x128xf32>
    %21 = vector.broadcast %20 : vector<1x128xf32> to vector<16x128xf32>
    %22 = arith.addf %19, %21 : vector<16x128xf32>
    %c0_17 = arith.constant 0 : index
    %c0_18 = arith.constant 0 : index
    %23 = vector.load %arg8[%c0_17, %c0_18] : memref<16x128xf32, #tpu.memory_space<vmem>>, vector<16x128xf32>
    tpu.vector_store %arg8[%c0_17, %c0_18], %22 {strides = array<i32>} : memref<16x128xf32, #tpu.memory_space<vmem>>, vector<16x128xf32>,
    return
  }
  func.func @transform_0(%arg0: i32) -> (i32, i32) {
    %c0_i32 = arith.constant 0 : i32
    %c0_i32_0 = arith.constant 0 : i32
    return %arg0, %c0_i32 : i32, i32
  }
  func.func @transform_1(%arg0: i32) -> (i32, i32) {
    %c0_i32 = arith.constant 0 : i32
    %c0_i32_0 = arith.constant 0 : i32
    %c0_i32_1 = arith.constant 0 : i32
    return %c0_i32, %c0_i32_0 : i32, i32
  }
  func.func @transform_2(%arg0: i32) -> (i32, i32) {
    %c0_i32 = arith.constant 0 : i32
    %c0_i32_0 = arith.constant 0 : i32
    %c0_i32_1 = arith.constant 0 : i32
    return %c0_i32, %c0_i32_0 : i32, i32
  }
  func.func @transform_3(%arg0: i32) -> (i32, i32) {
    %c0_i32 = arith.constant 0 : i32
    %c0_i32_0 = arith.constant 0 : i32
    %c0_i32_1 = arith.constant 0 : i32
    return %c0_i32, %c0_i32_0 : i32, i32
  }
  func.func @transform_4(%arg0: i32) -> (i32, i32) {
    %c0_i32 = arith.constant 0 : i32
    %c0_i32_0 = arith.constant 0 : i32
    %c0_i32_1 = arith.constant 0 : i32
    return %c0_i32, %c0_i32_0 : i32, i32
  }
  func.func @transform_5(%arg0: i32) -> (i32, i32) {
    %c0_i32 = arith.constant 0 : i32
    %c0_i32_0 = arith.constant 0 : i32
    %c0_i32_1 = arith.constant 0 : i32
    return %c0_i32, %c0_i32_0 : i32, i32
  }
  func.func @transform_6(%arg0: i32) -> (i32, i32) {
    %c0_i32 = arith.constant 0 : i32
    %c0_i32_0 = arith.constant 0 : i32
    %c0_i32_1 = arith.constant 0 : i32
    return %c0_i32, %c0_i32_0 : i32, i32
  }
  func.func @transform_7(%arg0: i32) -> (i32, i32) {
    %c0_i32 = arith.constant 0 : i32
    %c0_i32_0 = arith.constant 0 : i32
    return %arg0, %c0_i32 : i32, i32
  }
}

module attributes {stable_mosaic.version = 11 : i64} {
  func.func @kernel(%arg0: i32, %arg1: memref<16x128xf32, #tpu.memory_space<vmem>>, %arg2: memref<128x128xbf16, #tpu.memory_space<vmem>>, %arg3: memref<1x128xf32, #tpu.memory_space<vmem>>, %arg4: memref<128x128xbf16, #tpu.memory_space<vmem>>, %arg5: memref<1x128xf32, #tpu.memory_space<vmem>>, %arg6: memref<128x128xbf16, #tpu.memory_space<vmem>>, %arg7: memref<1x128xf32, #tpu.memory_space<vmem>>, %arg8: memref<16x128xf32, #tpu.memory_space<vmem>>) attributes {dimension_semantics = [#tpu.dimension_semantics<parallel>], iteration_bounds = array<i64: 1>, scalar_prefetch = 0 : i64, scratch_operands = 0 : i64, tpu.core_type = #tpu.core_type<tc>, window_params = [{transform_indices = @transform_0, window_bounds = array<i64: 16, 128>}, {pipeline_mode = #tpu.pipeline_mode<synchronous>, transform_indices = @transform_1, window_bounds = array<i64: 128, 128>}, {pipeline_mode = #tpu.pipeline_mode<synchronous>, transform_indices = @transform_2, window_bounds = array<i64: 1, 128>}, {pipeline_mode = #tpu.pipeline_mode<synchronous>, transform_indices = @transform_3, window_bounds = array<i64: 128, 128>}, {pipeline_mode = #tpu.pipeline_mode<synchronous>, transform_indices = @transform_4, window_bounds = array<i64: 1, 128>}, {pipeline_mode = #tpu.pipeline_mode<synchronous>, transform_indices = @transform_5, window_bounds = array<i64: 128, 128>}, {pipeline_mode = #tpu.pipeline_mode<synchronous>, transform_indices = @transform_6, window_bounds = array<i64: 1, 128>}, {transform_indices = @transform_7, window_bounds = array<i64: 16, 128>}]} {
    %c0 = arith.constant 0 : index
    %c0_0 = arith.constant 0 : index
    %0 = vector.load %arg1[%c0, %c0_0] : memref<16x128xf32, #tpu.memory_space<vmem>>, vector<16x128xf32>
    %1 = arith.truncf %0 : vector<16x128xf32> to vector<16x128xbf16>
    %c0_1 = arith.constant 0 : index
    %c0_2 = arith.constant 0 : index
    %2 = vector.load %arg2[%c0_1, %c0_2] : memref<128x128xbf16, #tpu.memory_space<vmem>>, vector<128x128xbf16>
    %cst = arith.constant dense<0.000000e+00> : vector<16x128xf32>
    %3 = tpu.matmul %1, %2, %cst {dimension_numbers = #tpu.dot_dimension_numbers<[1], [0], [0], [1], [0, 0, 1, 1], [], []>} : vector<16x128xbf16>, vector<128x128xbf16>, vector<16x128xf32> -> vector<16x128xf32>
    %c0_3 = arith.constant 0 : index
    %c0_4 = arith.constant 0 : index
    %4 = vector.load %arg3[%c0_3, %c0_4] : memref<1x128xf32, #tpu.memory_space<vmem>>, vector<1x128xf32>
    %5 = vector.broadcast %4 : vector<1x128xf32> to vector<16x128xf32>
    %6 = arith.addf %3, %5 : vector<16x128xf32>
    %cst_5 = arith.constant 0.000000e+00 : f32
    %7 = vector.broadcast %cst_5 : f32 to vector<16x128xf32>
    %8 = arith.maximumf %6, %7 : vector<16x128xf32>
    %9 = arith.truncf %8 : vector<16x128xf32> to vector<16x128xbf16>
    %c0_6 = arith.constant 0 : index
    %c0_7 = arith.constant 0 : index
    %10 = vector.load %arg4[%c0_6, %c0_7] : memref<128x128xbf16, #tpu.memory_space<vmem>>, vector<128x128xbf16>
    %cst_8 = arith.constant dense<0.000000e+00> : vector<16x128xf32>
    %11 = tpu.matmul %9, %10, %cst_8 {dimension_numbers = #tpu.dot_dimension_numbers<[1], [0], [0], [1], [0, 0, 1, 1], [], []>} : vector<16x128xbf16>, vector<128x128xbf16>, vector<16x128xf32> -> vector<16x128xf32>
    %c0_9 = arith.constant 0 : index
    %c0_10 = arith.constant 0 : index
    %12 = vector.load %arg5[%c0_9, %c0_10] : memref<1x128xf32, #tpu.memory_space<vmem>>, vector<1x128xf32>
    %13 = vector.broadcast %12 : vector<1x128xf32> to vector<16x128xf32>
    %14 = arith.addf %11, %13 : vector<16x128xf32>
    %cst_11 = arith.constant 0.000000e+00 : f32
    %15 = vector.broadcast %cst_11 : f32 to vector<16x128xf32>
    %16 = arith.maximumf %14, %15 : vector<16x128xf32>
    %17 = arith.truncf %16 : vector<16x128xf32> to vector<16x128xbf16>
    %c0_12 = arith.constant 0 : index
    %c0_13 = arith.constant 0 : index
    %18 = vector.load %arg6[%c0_12, %c0_13] : memref<128x128xbf16, #tpu.memory_space<vmem>>, vector<128x128xbf16>
    %cst_14 = arith.constant dense<0.000000e+00> : vector<16x128xf32>
    %19 = tpu.matmul %17, %18, %cst_14 {dimension_numbers = #tpu.dot_dimension_numbers<[1], [0], [0], [1], [0, 0, 1, 1], [], []>} : vector<16x128xbf16>, vector<128x128xbf16>, vector<16x128xf32> -> vector<16x128xf32>
    %c0_15 = arith.constant 0 : index
    %c0_16 = arith.constant 0 : index
    %20 = vector.load %arg7[%c0_15, %c0_16] : memref<1x128xf32, #tpu.memory_space<vmem>>, vector<1x128xf32>
    %21 = vector.broadcast %20 : vector<1x128xf32> to vector<16x128xf32>
    %22 = arith.addf %19, %21 : vector<16x128xf32>
    %c0_17 = arith.constant 0 : index
    %c0_18 = arith.constant 0 : index
    %23 = vector.load %arg8[%c0_17, %c0_18] : memref<16x128xf32, #tpu.memory_space<vmem>>, vector<16x128xf32>
    tpu.vector_store %arg8[%c0_17, %c0_18], %22 {strides = array<i32>} : memref<16x128xf32, #tpu.memory_space<vmem>>, vector<16x128xf32>,
    return
  }
  func.func @transform_0(%arg0: i32) -> (i32, i32) {
    %c0_i32 = arith.constant 0 : i32
    %c0_i32_0 = arith.constant 0 : i32
    return %arg0, %c0_i32 : i32, i32
  }
  func.func @transform_1(%arg0: i32) -> (i32, i32) {
    %c0_i32 = arith.constant 0 : i32
    %c0_i32_0 = arith.constant 0 : i32
    %c0_i32_1 = arith.constant 0 : i32
    return %c0_i32, %c0_i32_0 : i32, i32
  }
  func.func @transform_2(%arg0: i32) -> (i32, i32) {
    %c0_i32 = arith.constant 0 : i32
    %c0_i32_0 = arith.constant 0 : i32
    %c0_i32_1 = arith.constant 0 : i32
    return %c0_i32, %c0_i32_0 : i32, i32
  }
  func.func @transform_3(%arg0: i32) -> (i32, i32) {
    %c0_i32 = arith.constant 0 : i32
    %c0_i32_0 = arith.constant 0 : i32
    %c0_i32_1 = arith.constant 0 : i32
    return %c0_i32, %c0_i32_0 : i32, i32
  }
  func.func @transform_4(%arg0: i32) -> (i32, i32) {
    %c0_i32 = arith.constant 0 : i32
    %c0_i32_0 = arith.constant 0 : i32
    %c0_i32_1 = arith.constant 0 : i32
    return %c0_i32, %c0_i32_0 : i32, i32
  }
  func.func @transform_5(%arg0: i32) -> (i32, i32) {
    %c0_i32 = arith.constant 0 : i32
    %c0_i32_0 = arith.constant 0 : i32
    %c0_i32_1 = arith.constant 0 : i32
    return %c0_i32, %c0_i32_0 : i32, i32
  }
  func.func @transform_6(%arg0: i32) -> (i32, i32) {
    %c0_i32 = arith.constant 0 : i32
    %c0_i32_0 = arith.constant 0 : i32
    %c0_i32_1 = arith.constant 0 : i32
    return %c0_i32, %c0_i32_0 : i32, i32
  }
  func.func @transform_7(%arg0: i32) -> (i32, i32) {
    %c0_i32 = arith.constant 0 : i32
    %c0_i32_0 = arith.constant 0 : i32
    return %arg0, %c0_i32 : i32, i32
  }
}

module attributes {stable_mosaic.version = 11 : i64} {
  func.func @kernel(%arg0: i32, %arg1: i32, %arg2: i32, %arg3: memref<16x128xf32, #tpu.memory_space<vmem>>, %arg4: memref<128x128xbf16, #tpu.memory_space<vmem>>, %arg5: memref<1x128xf32, #tpu.memory_space<vmem>>, %arg6: memref<16x128xbf16, #tpu.memory_space<vmem>>, %arg7: memref<16x128xf32, #tpu.memory_space<vmem>>) attributes {dimension_semantics = [#tpu.dimension_semantics<parallel>, #tpu.dimension_semantics<parallel>, #tpu.dimension_semantics<arbitrary>], iteration_bounds = array<i64: 1, 1, 1>, scalar_prefetch = 0 : i64, scratch_operands = 1 : i64, tpu.core_type = #tpu.core_type<tc>, window_params = [{transform_indices = @transform_0, window_bounds = array<i64: 16, 128>}, {transform_indices = @transform_1, window_bounds = array<i64: 128, 128>}, {transform_indices = @transform_2, window_bounds = array<i64: 1, 128>}, {transform_indices = @transform_3, window_bounds = array<i64: 16, 128>}]} {
    %c0_i32 = arith.constant 0 : i32
    %0 = arith.cmpi eq, %arg2, %c0_i32 : i32
    %1 = arith.extui %0 : i1 to i32
    %c0_i32_0 = arith.constant 0 : i32
    %2 = arith.cmpi ne, %1, %c0_i32_0 : i32
    scf.if %2 {
      %cst_10 = arith.constant 0.000000e+00 : f32
      %13 = vector.broadcast %cst_10 : f32 to vector<16x128xf32>
      %c0_11 = arith.constant 0 : index
      %c0_12 = arith.constant 0 : index
      %14 = vector.load %arg7[%c0_11, %c0_12] : memref<16x128xf32, #tpu.memory_space<vmem>>, vector<16x128xf32>
      tpu.vector_store %arg7[%c0_11, %c0_12], %13 {strides = array<i32>} : memref<16x128xf32, #tpu.memory_space<vmem>>, vector<16x128xf32>,
    } else {
    }
    %c0 = arith.constant 0 : index
    %c0_1 = arith.constant 0 : index
    %3 = vector.load %arg7[%c0, %c0_1] : memref<16x128xf32, #tpu.memory_space<vmem>>, vector<16x128xf32>
    %c0_2 = arith.constant 0 : index
    %c0_3 = arith.constant 0 : index
    %4 = vector.load %arg3[%c0_2, %c0_3] : memref<16x128xf32, #tpu.memory_space<vmem>>, vector<16x128xf32>
    %5 = arith.truncf %4 : vector<16x128xf32> to vector<16x128xbf16>
    %c0_4 = arith.constant 0 : index
    %c0_5 = arith.constant 0 : index
    %6 = vector.load %arg4[%c0_4, %c0_5] : memref<128x128xbf16, #tpu.memory_space<vmem>>, vector<128x128xbf16>
    %cst = arith.constant dense<0.000000e+00> : vector<16x128xf32>
    %7 = tpu.matmul %5, %6, %cst {dimension_numbers = #tpu.dot_dimension_numbers<[1], [0], [0], [1], [0, 0, 1, 1], [], []>} : vector<16x128xbf16>, vector<128x128xbf16>, vector<16x128xf32> -> vector<16x128xf32>
    %8 = arith.addf %3, %7 : vector<16x128xf32>
    %c0_6 = arith.constant 0 : index
    %c0_7 = arith.constant 0 : index
    %9 = vector.load %arg7[%c0_6, %c0_7] : memref<16x128xf32, #tpu.memory_space<vmem>>, vector<16x128xf32>
    tpu.vector_store %arg7[%c0_6, %c0_7], %8 {strides = array<i32>} : memref<16x128xf32, #tpu.memory_space<vmem>>, vector<16x128xf32>,
    %c0_i32_8 = arith.constant 0 : i32
    %10 = arith.cmpi eq, %arg2, %c0_i32_8 : i32
    %11 = arith.extui %10 : i1 to i32
    %c0_i32_9 = arith.constant 0 : i32
    %12 = arith.cmpi ne, %11, %c0_i32_9 : i32
    scf.if %12 {
      %c0_10 = arith.constant 0 : index
      %c0_11 = arith.constant 0 : index
      %13 = vector.load %arg7[%c0_10, %c0_11] : memref<16x128xf32, #tpu.memory_space<vmem>>, vector<16x128xf32>
      %c0_12 = arith.constant 0 : index
      %c0_13 = arith.constant 0 : index
      %14 = vector.load %arg5[%c0_12, %c0_13] : memref<1x128xf32, #tpu.memory_space<vmem>>, vector<1x128xf32>
      %15 = vector.broadcast %14 : vector<1x128xf32> to vector<16x128xf32>
      %16 = arith.addf %13, %15 : vector<16x128xf32>
      %cst_14 = arith.constant 0.000000e+00 : f32
      %17 = vector.broadcast %cst_14 : f32 to vector<16x128xf32>
      %18 = arith.maximumf %16, %17 : vector<16x128xf32>
      %19 = arith.truncf %18 : vector<16x128xf32> to vector<16x128xbf16>
      %c0_15 = arith.constant 0 : index
      %c0_16 = arith.constant 0 : index
      %20 = vector.load %arg6[%c0_15, %c0_16] : memref<16x128xbf16, #tpu.memory_space<vmem>>, vector<16x128xbf16>
      tpu.vector_store %arg6[%c0_15, %c0_16], %19 {strides = array<i32>} : memref<16x128xbf16, #tpu.memory_space<vmem>>, vector<16x128xbf16>,
    } else {
    }
    return
  }
  func.func @transform_0(%arg0: i32, %arg1: i32, %arg2: i32) -> (i32, i32) {
    %c0_i32 = arith.constant 0 : i32
    return %arg0, %arg2 : i32, i32
  }
  func.func @transform_1(%arg0: i32, %arg1: i32, %arg2: i32) -> (i32, i32) {
    %c0_i32 = arith.constant 0 : i32
    return %arg2, %arg1 : i32, i32
  }
  func.func @transform_2(%arg0: i32, %arg1: i32, %arg2: i32) -> (i32, i32) {
    %c0_i32 = arith.constant 0 : i32
    %c0_i32_0 = arith.constant 0 : i32
    return %c0_i32, %arg1 : i32, i32
  }
  func.func @transform_3(%arg0: i32, %arg1: i32, %arg2: i32) -> (i32, i32) {
    %c0_i32 = arith.constant 0 : i32
    return %arg0, %arg1 : i32, i32
  }
}

</mosaic_0001>

<bundles_post_ra>
// kernel: tpu_custom_call.1
= control target key start
LH: loop header
LB: loop body
LE: loop exit
PB: predicated region body
PF: predicated region fallthrough
CT: control target
= control target key end

     0   :  { %12 = vsyncpa [#allocation3], 0  ;;  %s888_s0 = inlined_call_operand.hbm [shape: f32[16,128], index: 0, kind: input, shape index: {}]   ;;  %s889_s1 = inlined_call_operand.hbm [shape: bf16[128,128], index: 1, kind: input, shape index: {}]   ;;  %s890_s2 = inlined_call_operand.vmem [shape: f32[1,128], index: 2, kind: input, shape index: {}]   ;;  %s891_s3 = inlined_call_operand.hbm [shape: bf16[128,128], index: 3, kind: input, shape index: {}]   ;;  %s892_s4 = inlined_call_operand.vmem [shape: f32[1,128], index: 4, kind: input, shape index: {}]   ;;  %s893_s5 = inlined_call_operand.hbm [shape: bf16[128,128], index: 5, kind: input, shape index: {}]   ;;  %s894_s6 = inlined_call_operand.vmem [shape: f32[1,128], index: 6, kind: input, shape index: {}]   ;;  %s895_s7 = inlined_call_operand.hbm [shape: f32[16,128], index: 7, kind: output, shape index: {}]  }
   0x1   :  { %13 = vsyncpa [#allocation6], 0 }
   0x2   :  { %14 = vsyncpa [#allocation9], 0 }
   0x3   :  { %15 = vsyncpa [#allocation4], 0  ;;  %s716_s24 = smov [#allocation5]   ;;  %s598_s28 = scalar_lea.hbm %s889_s1, 1024 }
   0x4   :  { %s33_s25 = sshll.u32 %s716_s24, 4  ;;  %p599_p0 = scmp.ne.s32.totalorder %s889_s1, %s598_s28  ;;  %s34_s25 = int_to_ptr.vmem [resolvable:$true] %s33_s25 }
   0x5   :  { %p602_p1 = scmp.lt.u32.totalorder %s598_s28, %s889_s1 }
   0x7   :  { %p604_p2 = pnand %p602_p1, %p599_p0 }
   0x9   :  { %607 = shalt.err (!%p604_p2)
}
   0xa   :  { %s608_s10 = scalar_lea.vmem %s34_s25, 1024  ;;  %p613_p4 = scmp.lt.s32.totalorder %s34_s25, %s34_s25 }
   0xb   :  { %p609_p3 = scmp.ne.s32.totalorder %s34_s25, %s608_s10  ;;  %p614_p5 = scmp.lt.s32.totalorder %s608_s10, %s608_s10 }
   0xd   :  { %p615_p6 = por %p614_p5, %p613_p4 }
   0xf   :  { %p616_p7 = pnand %p615_p6, %p609_p3 }
  0x11   :  { %619 = shalt.err (!%p616_p7)
}
  0x12   :  { %s717_s11 = smov 64   ;;  %s718_s12 = smov 4  }
  0x13   :  { %39 = dma.hbm_to_vmem [thread:$0]  %s889_s1, 1024, %s34_s25, [#allocation6], %s717_s11, %s717_s11, %s718_s12  }
  0x14   :  { %s719_s15 = smov [#allocation2]   ;;  %s620_s19 = scalar_lea.hbm %s888_s0, 256 }
  0x15   :  { %s21_s16 = sshll.u32 %s719_s15, 4  ;;  %p621_p8 = scmp.ne.s32.totalorder %s888_s0, %s620_s19  ;;  %s22_s16 = int_to_ptr.vmem [resolvable:$true] %s21_s16 }
  0x16   :  { %p624_p9 = scmp.lt.u32.totalorder %s620_s19, %s888_s0 }
  0x18   :  { %p626_p10 = pnand %p624_p9, %p621_p8 }
  0x1a   :  { %629 = shalt.err (!%p626_p10)
}
  0x1b   :  { %s630_s24 = scalar_lea.vmem %s22_s16, 256  ;;  %p635_p12 = scmp.lt.s32.totalorder %s22_s16, %s22_s16 }
  0x1c   :  { %p631_p11 = scmp.ne.s32.totalorder %s22_s16, %s630_s24  ;;  %p636_p13 = scmp.lt.s32.totalorder %s630_s24, %s630_s24 }
  0x1e   :  { %p637_p0 = por %p636_p13, %p635_p12 }
  0x20   :  { %p638_p1 = pnand %p637_p0, %p631_p11 }
  0x22   :  { %641 = shalt.err (!%p638_p1)
}
  0x23   :  { %s720_s1 = smov 128   ;;  %s721_s25 = smov 8  }
  0x24   :  { %27 = dma.hbm_to_vmem [thread:$0]  %s888_s0, 256, %s22_s16, [#allocation3], %s720_s1, %s720_s1, %s721_s25  }
  0x25   :  { %s722_s28 = smov [#allocation7]   ;;  %s723_s30 = smov [#allocation8]  }
  0x26   :  { %s47_s29 = sshll.u32 %s722_s28, 4  ;;  %s61_s8 = sshll.u32 %s723_s30, 4  ;;  %s48_s29 = int_to_ptr.vmem [resolvable:$true] %s47_s29  ;;  %s797_s8 = int_to_ptr.vmem [resolvable:$true] %s61_s8 }
  0x27   :  { %s642_s13 = scalar_lea.hbm %s891_s3, 1024 }
  0x28   :  { %p643_p2 = scmp.ne.s32.totalorder %s891_s3, %s642_s13  ;;  %p646_p3 = scmp.lt.u32.totalorder %s642_s13, %s891_s3 }
  0x2a   :  { %p648_p4 = pnand %p646_p3, %p643_p2 }
  0x2c   :  { %651 = shalt.err (!%p648_p4)
}
  0x2d   :  { %s652_s0 = scalar_lea.vmem %s48_s29, 1024  ;;  %p657_p6 = scmp.lt.s32.totalorder %s48_s29, %s48_s29 }
  0x2e   :  { %p653_p5 = scmp.ne.s32.totalorder %s48_s29, %s652_s0  ;;  %p658_p7 = scmp.lt.s32.totalorder %s652_s0, %s652_s0 }
  0x30   :  { %p659_p8 = por %p658_p7, %p657_p6 }
  0x32   :  { %p660_p9 = pnand %p659_p8, %p653_p5 }
  0x34   :  { %663 = shalt.err (!%p660_p9)
}
  0x35   :  { %53 = dma.hbm_to_vmem [thread:$0]  %s891_s3, 1024, %s48_s29, [#allocation6], %s717_s11, %s717_s11, %s718_s12  }
  0x36   :  { %s664_s22 = scalar_lea.hbm %s893_s5, 1024 }
  0x37   :  { %p665_p10 = scmp.ne.s32.totalorder %s893_s5, %s664_s22  ;;  %p668_p11 = scmp.lt.u32.totalorder %s664_s22, %s893_s5 }
  0x39   :  { %p670_p12 = pnand %p668_p11, %p665_p10 }
  0x3b   :  { %673 = shalt.err (!%p670_p12)
}
  0x3c   :  { %s674_s28 = scalar_lea.vmem %s797_s8, 1024  ;;  %p679_p0 = scmp.lt.s32.totalorder %s797_s8, %s797_s8 }
  0x3d   :  { %p675_p13 = scmp.ne.s32.totalorder %s797_s8, %s674_s28  ;;  %p680_p1 = scmp.lt.s32.totalorder %s674_s28, %s674_s28 }
  0x3f   :  { %p681_p2 = por %p680_p1, %p679_p0 }
  0x41   :  { %p682_p3 = pnand %p681_p2, %p675_p13 }
  0x43   :  { %685 = shalt.err (!%p682_p3)
}
  0x44   :  { %67 = dma.hbm_to_vmem [thread:$0]  %s893_s5, 1024, %s797_s8, [#allocation9], %s717_s11, %s717_s11, %s718_s12  }
  0x45   :  { %708 = dma.done.wait [#allocation3], 256  }
  0x46   :  { %709 = vsyncadd [#allocation3], 4294967040 }
  0x47   :  { %710 = dma.done.wait [#allocation6], 2048  }
  0x48   :  { %711 = vsyncadd [#allocation6], 4294965248 }
  0x49   :  { %712 = dma.done.wait [#allocation9], 1024  }
  0x4a   :  { %713 = vsyncadd [#allocation9], 4294966272  ;;  %v724_v0 = vmov 0.0   ;;  %vm725_vm0 = vmmov 0   ;;  %v574_v1 = vld [vmem:[#allocation5] sm:$0xff]   ;;  %v575_v2 = vld [vmem:[#allocation5 + $0x8] sm:$0xff]  }
  0x4b   :  { %503 = vmatprep.subr.bf16.mxu0 %v724_v0  ;;  %519 = vmatprep.mubr.msk.bf16.mxu0 %vm725_vm0, %v724_v0  ;;  %v576_v3 = vld [vmem:[#allocation5 + $0x10] sm:$0xff]   ;;  %v582_v4 = vld [vmem:[#allocation7] sm:$0xff]   ;;  %v577_v5 = vld [vmem:[#allocation5 + $0x18] sm:$0xff]   ;;  %s726_s9 = smov [#allocation10]  }
  0x4c   :  { %523 = vmatprep.subr.bf16.mxu1 %v724_v0  ;;  %539 = vmatprep.mubr.msk.bf16.mxu1 %vm725_vm0, %v724_v0  ;;  %v583_v6 = vld [vmem:[#allocation7 + $0x8] sm:$0xff]   ;;  %v578_v7 = vld [vmem:[#allocation5 + $0x20] sm:$0xff]   ;;  %v584_v8 = vld [vmem:[#allocation7 + $0x10] sm:$0xff]   ;;  %s435_s10 = sshll.u32 %s726_s9, 4  ;;  %s436_s10 = int_to_ptr.vmem [resolvable:$true] %s435_s10 }
  0x4d   :  { %504 = vmatpush3.bf16.msra.mxu0 %v574_v1  ;;  %524 = vmatpush3.bf16.msra.mxu1 %v582_v4  ;;  %v579_v9 = vld [vmem:[#allocation5 + $0x28] sm:$0xff]   ;;  %v585_v10 = vld [vmem:[#allocation7 + $0x18] sm:$0xff]   ;;  %v580_v11 = vld [vmem:[#allocation5 + $0x30] sm:$0xff]   ;;  %p691_p5 = scmp.lt.s32.totalorder %s436_s10, %s436_s10 }
  0x4e   :  { %505 = vmatprep.subr.bf16.mxu0 %v724_v0  ;;  %525 = vmatprep.subr.bf16.mxu1 %v724_v0  ;;  %v586_v12 = vld [vmem:[#allocation7 + $0x20] sm:$0xff]   ;;  %v581_v13 = vld [vmem:[#allocation5 + $0x38] sm:$0xff]   ;;  %v83_v14 = vld [vmem:[#allocation2] sm:$0xff] }
  0x4f   :  { %v84_v15 = vld [vmem:[#allocation2 + $0x8] sm:$0xff]  ;;  %v587_v16 = vld [vmem:[#allocation7 + $0x28] sm:$0xff]   ;;  %v588_v18 = vld [vmem:[#allocation7 + $0x30] sm:$0xff]  }
  0x50   :  { %v85_v17 = vpack.c.bf16 %v84_v15, %v83_v14  ;;  %v589_v19 = vld [vmem:[#allocation7 + $0x38] sm:$0xff]   ;;  %v590_v20 = vld [vmem:[#allocation8] sm:$0xff]   ;;  %v591_v21 = vld [vmem:[#allocation8 + $0x8] sm:$0xff]  }
  0x51   :  { %506 = vmatpush3.bf16.msra.mxu0 %v575_v2  ;;  %526 = vmatpush3.bf16.msra.mxu1 %v583_v6  ;;  %v592_v22 = vld [vmem:[#allocation8 + $0x10] sm:$0xff]   ;;  %v593_v23 = vld [vmem:[#allocation8 + $0x18] sm:$0xff]   ;;  %v594_v24 = vld [vmem:[#allocation8 + $0x20] sm:$0xff]  }
  0x52   :  { %507 = vmatprep.subr.bf16.mxu0 %v724_v0  ;;  %527 = vmatprep.subr.bf16.mxu1 %v724_v0  ;;  %v595_v25 = vld [vmem:[#allocation8 + $0x28] sm:$0xff]   ;;  %v449_v26 = vld [vmem:[%s890_s2] ss:$0 sm:$0xff]  ;;  %v597_v37 = vld [vmem:[#allocation8 + $0x38] sm:$0xff]  }
  0x53   :  { %v596_v36 = vld [vmem:[#allocation8 + $0x30] sm:$0xff]  }
  0x54   :  { %v458_v38 = vld [vmem:[%s892_s4] ss:$0 sm:$0xff]  ;;  %s686_s4 = scalar_lea.vmem %s436_s10, 256 }
  0x55   :  { %508 = vmatpush3.bf16.msra.mxu0 %v576_v3  ;;  %528 = vmatpush3.bf16.msra.mxu1 %v584_v8  ;;  %v467_v48 = vld [vmem:[%s894_s6] ss:$0 sm:$0xff]  ;;  %p687_p4 = scmp.ne.s32.totalorder %s436_s10, %s686_s4  ;;  %p692_p6 = scmp.lt.s32.totalorder %s686_s4, %s686_s4 }
  0x56   :  { %509 = vmatprep.subr.bf16.mxu0 %v724_v0  ;;  %529 = vmatprep.subr.bf16.mxu1 %v724_v0 }
  0x57   :  { %p693_p7 = por %p692_p6, %p691_p5 }
  0x59   :  { %510 = vmatpush3.bf16.msra.mxu0 %v577_v5  ;;  %530 = vmatpush3.bf16.msra.mxu1 %v585_v10  ;;  %p694_p8 = pnand %p693_p7, %p687_p4 }
  0x5a   :  { %511 = vmatprep.subr.bf16.mxu0 %v724_v0  ;;  %531 = vmatprep.subr.bf16.mxu1 %v724_v0 }
  0x5d   :  { %512 = vmatpush3.bf16.msra.mxu0 %v578_v7  ;;  %532 = vmatpush3.bf16.msra.mxu1 %v586_v12 }
  0x5e   :  { %513 = vmatprep.subr.bf16.mxu0 %v724_v0  ;;  %533 = vmatprep.subr.bf16.mxu1 %v724_v0 }
  0x61   :  { %514 = vmatpush3.bf16.msra.mxu0 %v579_v9  ;;  %534 = vmatpush3.bf16.msra.mxu1 %v587_v16 }
  0x62   :  { %515 = vmatprep.subr.bf16.mxu0 %v724_v0  ;;  %535 = vmatprep.subr.bf16.mxu1 %v724_v0 }
  0x65   :  { %516 = vmatpush3.bf16.msra.mxu0 %v580_v11  ;;  %536 = vmatpush3.bf16.msra.mxu1 %v588_v18 }
  0x66   :  { %517 = vmatprep.subr.bf16.mxu0 %v724_v0  ;;  %537 = vmatprep.subr.bf16.mxu1 %v724_v0 }
  0x69   :  { %518 = vmatpush3.bf16.msra.mxu0 %v581_v13  ;;  %538 = vmatpush3.bf16.msra.mxu1 %v589_v19 }
  0x6a   :  { %543 = vmatprep.subr.bf16.mxu0 %v724_v0 }
  0x6c   :  { %520 = vmatmul.mubr.bf16.vlgmr.msra.gmra.mrb[0].mxu0 %v85_v17 }
  0x6d   :  { %559 = vmatprep.mubr.msk.bf16.mxu0 %vm725_vm0, %v724_v0  ;;  %544 = vmatpush3.bf16.msra.mxu0 %v590_v20 }
  0x6e   :  { %545 = vmatprep.subr.bf16.mxu0 %v724_v0 }
  0x71   :  { %546 = vmatpush3.bf16.msra.mxu0 %v591_v21 }
  0x72   :  { %547 = vmatprep.subr.bf16.mxu0 %v724_v0 }
  0x75   :  { %548 = vmatpush3.bf16.msra.mxu0 %v592_v22 }
  0x76   :  { %549 = vmatprep.subr.bf16.mxu0 %v724_v0 }
  0x79   :  { %550 = vmatpush3.bf16.msra.mxu0 %v593_v23 }
  0x7a   :  { %551 = vmatprep.subr.bf16.mxu0 %v724_v0 }
  0x7d   :  { %552 = vmatpush3.bf16.msra.mxu0 %v594_v24 }
  0x7e   :  { %553 = vmatprep.subr.bf16.mxu0 %v724_v0 }
  0x81   :  { %554 = vmatpush3.bf16.msra.mxu0 %v595_v25 }
  0x82   :  { %555 = vmatprep.subr.bf16.mxu0 %v724_v0 }
  0x85   :  { %556 = vmatpush3.bf16.msra.mxu0 %v596_v36 }
  0x86   :  { %557 = vmatprep.subr.bf16.mxu0 %v724_v0 }
  0x89   :  { %558 = vmatpush3.bf16.msra.mxu0 %v597_v37 }
 0x13f   :  { %v191_v27 = vpop.f32.mrb[0].mxu0 }
 0x140   :  { %v192_v28 = vadd.f32 %v449_v26, %v191_v27  ;;  %v521_v29 = vpop.f32.mrb[1].mxu0 }
 0x141   :  { %v194_v30 = vpop.f32.mrb[2].mxu0 }
 0x142   :  { %v195_v31 = vadd.f32 %v449_v26, %v194_v30  ;;  %v522_v32 = vpop.f32.mrb[3].mxu0  ;;  %v198_v33 = vmax.f32 %v192_v28, 0.0 }
 0x144   :  { %v199_v34 = vmax.f32 %v195_v31, 0.0 }
 0x146   :  { %v200_v35 = vpack.c.bf16 %v199_v34, %v198_v33 }
 0x148   :  { %540 = vmatmul.mubr.bf16.vlgmr.msra.gmra.mrb[0].mxu1 %v200_v35 }
 0x21b   :  { %v306_v39 = vpop.f32.mrb[0].mxu1 }
 0x21c   :  { %v307_v40 = vadd.f32 %v458_v38, %v306_v39  ;;  %v541_v41 = vpop.f32.mrb[1].mxu1 }
 0x21d   :  { %v309_v42 = vpop.f32.mrb[2].mxu1 }
 0x21e   :  { %v310_v43 = vadd.f32 %v458_v38, %v309_v42  ;;  %v542_v44 = vpop.f32.mrb[3].mxu1  ;;  %v313_v45 = vmax.f32 %v307_v40, 0.0 }
 0x220   :  { %v314_v46 = vmax.f32 %v310_v43, 0.0 }
 0x222   :  { %v315_v47 = vpack.c.bf16 %v314_v46, %v313_v45 }
 0x224   :  { %560 = vmatmul.mubr.bf16.vlgmr.msra.gmra.mrb[4].mxu0 %v315_v47 }
 0x2f7   :  { %v421_v49 = vpop.f32.mrb[4].mxu0 }
 0x2f8   :  { %v422_v50 = vadd.f32 %v467_v48, %v421_v49  ;;  %v561_v51 = vpop.f32.mrb[5].mxu0 }
 0x2f9   :  { %v424_v52 = vpop.f32.mrb[6].mxu0 }
 0x2fa   :  { %428 = vst [vmem:[#allocation10] sm:$0xff] %v422_v50  ;;  %v425_v53 = vadd.f32 %v467_v48, %v424_v52  ;;  %v562_v54 = vpop.f32.mrb[7].mxu0 }
 0x2fc   :  { %429 = vst [vmem:[#allocation10 + $0x8] sm:$0xff] %v425_v53 }
 0x2fd   :  { %697 = shalt.err (!%p694_p8)
}
 0x2fe   :  { %s698_s14 = scalar_lea.hbm %s895_s7, 256 }
 0x2ff   :  { %p699_p9 = scmp.ne.s32.totalorder %s895_s7, %s698_s14  ;;  %p702_p10 = scmp.lt.u32.totalorder %s698_s14, %s895_s7 }
 0x301   :  { %p704_p11 = pnand %p702_p10, %p699_p9 }
 0x303   :  { %707 = shalt.err (!%p704_p11)
}
 0x304   :  { %441 = dma.vmem_to_hbm [thread:$0]  %s436_s10, 256, %s895_s7, [#allocation4], %s720_s1, %s720_s1, %s721_s25  }
 0x305   :  { %714 = dma.done.wait [#allocation4], 256  }
 0x306   :  { %715 = vsyncadd [#allocation4], 4294967040 }
 0x307   :  { %445 = vsyncpa [#allocation3], 1 }
 0x308   :  { %446 = vsyncpa [#allocation6], 1 }
 0x309   :  { %447 = vsyncpa [#allocation9], 1 }
 0x30a   :  { %448 = vsyncpa [#allocation4], 1 }

// kernel: tpu_custom_call.1
= control target key start
LH: loop header
LB: loop body
LE: loop exit
PB: predicated region body
PF: predicated region fallthrough
CT: control target
= control target key end

     0   :  { %12 = vsyncpa [#allocation3], 0  ;;  %s888_s0 = inlined_call_operand.hbm [shape: f32[16,128], index: 0, kind: input, shape index: {}]   ;;  %s889_s1 = inlined_call_operand.hbm [shape: bf16[128,128], index: 1, kind: input, shape index: {}]   ;;  %s890_s2 = inlined_call_operand.vmem [shape: f32[1,128], index: 2, kind: input, shape index: {}]   ;;  %s891_s3 = inlined_call_operand.hbm [shape: bf16[128,128], index: 3, kind: input, shape index: {}]   ;;  %s892_s4 = inlined_call_operand.vmem [shape: f32[1,128], index: 4, kind: input, shape index: {}]   ;;  %s893_s5 = inlined_call_operand.hbm [shape: bf16[128,128], index: 5, kind: input, shape index: {}]   ;;  %s894_s6 = inlined_call_operand.vmem [shape: f32[1,128], index: 6, kind: input, shape index: {}]   ;;  %s895_s7 = inlined_call_operand.hbm [shape: f32[16,128], index: 7, kind: output, shape index: {}]  }
   0x1   :  { %13 = vsyncpa [#allocation6], 0 }
   0x2   :  { %14 = vsyncpa [#allocation9], 0 }
   0x3   :  { %15 = vsyncpa [#allocation4], 0  ;;  %s716_s24 = smov [#allocation5]   ;;  %s598_s28 = scalar_lea.hbm %s889_s1, 1024 }
   0x4   :  { %s33_s25 = sshll.u32 %s716_s24, 4  ;;  %p599_p0 = scmp.ne.s32.totalorder %s889_s1, %s598_s28  ;;  %s34_s25 = int_to_ptr.vmem [resolvable:$true] %s33_s25 }
   0x5   :  { %p602_p1 = scmp.lt.u32.totalorder %s598_s28, %s889_s1 }
   0x7   :  { %p604_p2 = pnand %p602_p1, %p599_p0 }
   0x9   :  { %607 = shalt.err (!%p604_p2)
}
   0xa   :  { %s608_s10 = scalar_lea.vmem %s34_s25, 1024  ;;  %p613_p4 = scmp.lt.s32.totalorder %s34_s25, %s34_s25 }
   0xb   :  { %p609_p3 = scmp.ne.s32.totalorder %s34_s25, %s608_s10  ;;  %p614_p5 = scmp.lt.s32.totalorder %s608_s10, %s608_s10 }
   0xd   :  { %p615_p6 = por %p614_p5, %p613_p4 }
   0xf   :  { %p616_p7 = pnand %p615_p6, %p609_p3 }
  0x11   :  { %619 = shalt.err (!%p616_p7)
}
  0x12   :  { %s717_s11 = smov 64   ;;  %s718_s12 = smov 4  }
  0x13   :  { %39 = dma.hbm_to_vmem [thread:$0]  %s889_s1, 1024, %s34_s25, [#allocation6], %s717_s11, %s717_s11, %s718_s12  }
  0x14   :  { %s719_s15 = smov [#allocation2]   ;;  %s620_s19 = scalar_lea.hbm %s888_s0, 256 }
  0x15   :  { %s21_s16 = sshll.u32 %s719_s15, 4  ;;  %p621_p8 = scmp.ne.s32.totalorder %s888_s0, %s620_s19  ;;  %s22_s16 = int_to_ptr.vmem [resolvable:$true] %s21_s16 }
  0x16   :  { %p624_p9 = scmp.lt.u32.totalorder %s620_s19, %s888_s0 }
  0x18   :  { %p626_p10 = pnand %p624_p9, %p621_p8 }
  0x1a   :  { %629 = shalt.err (!%p626_p10)
}
  0x1b   :  { %s630_s24 = scalar_lea.vmem %s22_s16, 256  ;;  %p635_p12 = scmp.lt.s32.totalorder %s22_s16, %s22_s16 }
  0x1c   :  { %p631_p11 = scmp.ne.s32.totalorder %s22_s16, %s630_s24  ;;  %p636_p13 = scmp.lt.s32.totalorder %s630_s24, %s630_s24 }
  0x1e   :  { %p637_p0 = por %p636_p13, %p635_p12 }
  0x20   :  { %p638_p1 = pnand %p637_p0, %p631_p11 }
  0x22   :  { %641 = shalt.err (!%p638_p1)
}
  0x23   :  { %s720_s1 = smov 128   ;;  %s721_s25 = smov 8  }
  0x24   :  { %27 = dma.hbm_to_vmem [thread:$0]  %s888_s0, 256, %s22_s16, [#allocation3], %s720_s1, %s720_s1, %s721_s25  }
  0x25   :  { %s722_s28 = smov [#allocation7]   ;;  %s723_s30 = smov [#allocation8]  }
  0x26   :  { %s47_s29 = sshll.u32 %s722_s28, 4  ;;  %s61_s8 = sshll.u32 %s723_s30, 4  ;;  %s48_s29 = int_to_ptr.vmem [resolvable:$true] %s47_s29  ;;  %s797_s8 = int_to_ptr.vmem [resolvable:$true] %s61_s8 }
  0x27   :  { %s642_s13 = scalar_lea.hbm %s891_s3, 1024 }
  0x28   :  { %p643_p2 = scmp.ne.s32.totalorder %s891_s3, %s642_s13  ;;  %p646_p3 = scmp.lt.u32.totalorder %s642_s13, %s891_s3 }
  0x2a   :  { %p648_p4 = pnand %p646_p3, %p643_p2 }
  0x2c   :  { %651 = shalt.err (!%p648_p4)
}
  0x2d   :  { %s652_s0 = scalar_lea.vmem %s48_s29, 1024  ;;  %p657_p6 = scmp.lt.s32.totalorder %s48_s29, %s48_s29 }
  0x2e   :  { %p653_p5 = scmp.ne.s32.totalorder %s48_s29, %s652_s0  ;;  %p658_p7 = scmp.lt.s32.totalorder %s652_s0, %s652_s0 }
  0x30   :  { %p659_p8 = por %p658_p7, %p657_p6 }
  0x32   :  { %p660_p9 = pnand %p659_p8, %p653_p5 }
  0x34   :  { %663 = shalt.err (!%p660_p9)
}
  0x35   :  { %53 = dma.hbm_to_vmem [thread:$0]  %s891_s3, 1024, %s48_s29, [#allocation6], %s717_s11, %s717_s11, %s718_s12  }
  0x36   :  { %s664_s22 = scalar_lea.hbm %s893_s5, 1024 }
  0x37   :  { %p665_p10 = scmp.ne.s32.totalorder %s893_s5, %s664_s22  ;;  %p668_p11 = scmp.lt.u32.totalorder %s664_s22, %s893_s5 }
  0x39   :  { %p670_p12 = pnand %p668_p11, %p665_p10 }
  0x3b   :  { %673 = shalt.err (!%p670_p12)
}
  0x3c   :  { %s674_s28 = scalar_lea.vmem %s797_s8, 1024  ;;  %p679_p0 = scmp.lt.s32.totalorder %s797_s8, %s797_s8 }
  0x3d   :  { %p675_p13 = scmp.ne.s32.totalorder %s797_s8, %s674_s28  ;;  %p680_p1 = scmp.lt.s32.totalorder %s674_s28, %s674_s28 }
  0x3f   :  { %p681_p2 = por %p680_p1, %p679_p0 }
  0x41   :  { %p682_p3 = pnand %p681_p2, %p675_p13 }
  0x43   :  { %685 = shalt.err (!%p682_p3)
}
  0x44   :  { %67 = dma.hbm_to_vmem [thread:$0]  %s893_s5, 1024, %s797_s8, [#allocation9], %s717_s11, %s717_s11, %s718_s12  }
  0x45   :  { %708 = dma.done.wait [#allocation3], 256  }
  0x46   :  { %709 = vsyncadd [#allocation3], 4294967040 }
  0x47   :  { %710 = dma.done.wait [#allocation6], 2048  }
  0x48   :  { %711 = vsyncadd [#allocation6], 4294965248 }
  0x49   :  { %712 = dma.done.wait [#allocation9], 1024  }
  0x4a   :  { %713 = vsyncadd [#allocation9], 4294966272  ;;  %v724_v0 = vmov 0.0   ;;  %vm725_vm0 = vmmov 0   ;;  %v574_v1 = vld [vmem:[#allocation5] sm:$0xff]   ;;  %v575_v2 = vld [vmem:[#allocation5 + $0x8] sm:$0xff]  }
  0x4b   :  { %503 = vmatprep.subr.bf16.mxu0 %v724_v0  ;;  %519 = vmatprep.mubr.msk.bf16.mxu0 %vm725_vm0, %v724_v0  ;;  %v576_v3 = vld [vmem:[#allocation5 + $0x10] sm:$0xff]   ;;  %v582_v4 = vld [vmem:[#allocation7] sm:$0xff]   ;;  %v577_v5 = vld [vmem:[#allocation5 + $0x18] sm:$0xff]   ;;  %s726_s9 = smov [#allocation10]  }
  0x4c   :  { %523 = vmatprep.subr.bf16.mxu1 %v724_v0  ;;  %539 = vmatprep.mubr.msk.bf16.mxu1 %vm725_vm0, %v724_v0  ;;  %v583_v6 = vld [vmem:[#allocation7 + $0x8] sm:$0xff]   ;;  %v578_v7 = vld [vmem:[#allocation5 + $0x20] sm:$0xff]   ;;  %v584_v8 = vld [vmem:[#allocation7 + $0x10] sm:$0xff]   ;;  %s435_s10 = sshll.u32 %s726_s9, 4  ;;  %s436_s10 = int_to_ptr.vmem [resolvable:$true] %s435_s10 }
  0x4d   :  { %504 = vmatpush3.bf16.msra.mxu0 %v574_v1  ;;  %524 = vmatpush3.bf16.msra.mxu1 %v582_v4  ;;  %v579_v9 = vld [vmem:[#allocation5 + $0x28] sm:$0xff]   ;;  %v585_v10 = vld [vmem:[#allocation7 + $0x18] sm:$0xff]   ;;  %v580_v11 = vld [vmem:[#allocation5 + $0x30] sm:$0xff]   ;;  %p691_p5 = scmp.lt.s32.totalorder %s436_s10, %s436_s10 }
  0x4e   :  { %505 = vmatprep.subr.bf16.mxu0 %v724_v0  ;;  %525 = vmatprep.subr.bf16.mxu1 %v724_v0  ;;  %v586_v12 = vld [vmem:[#allocation7 + $0x20] sm:$0xff]   ;;  %v581_v13 = vld [vmem:[#allocation5 + $0x38] sm:$0xff]   ;;  %v83_v14 = vld [vmem:[#allocation2] sm:$0xff] }
  0x4f   :  { %v84_v15 = vld [vmem:[#allocation2 + $0x8] sm:$0xff]  ;;  %v587_v16 = vld [vmem:[#allocation7 + $0x28] sm:$0xff]   ;;  %v588_v18 = vld [vmem:[#allocation7 + $0x30] sm:$0xff]  }
  0x50   :  { %v85_v17 = vpack.c.bf16 %v84_v15, %v83_v14  ;;  %v589_v19 = vld [vmem:[#allocation7 + $0x38] sm:$0xff]   ;;  %v590_v20 = vld [vmem:[#allocation8] sm:$0xff]   ;;  %v591_v21 = vld [vmem:[#allocation8 + $0x8] sm:$0xff]  }
  0x51   :  { %506 = vmatpush3.bf16.msra.mxu0 %v575_v2  ;;  %526 = vmatpush3.bf16.msra.mxu1 %v583_v6  ;;  %v592_v22 = vld [vmem:[#allocation8 + $0x10] sm:$0xff]   ;;  %v593_v23 = vld [vmem:[#allocation8 + $0x18] sm:$0xff]   ;;  %v594_v24 = vld [vmem:[#allocation8 + $0x20] sm:$0xff]  }
  0x52   :  { %507 = vmatprep.subr.bf16.mxu0 %v724_v0  ;;  %527 = vmatprep.subr.bf16.mxu1 %v724_v0  ;;  %v595_v25 = vld [vmem:[#allocation8 + $0x28] sm:$0xff]   ;;  %v449_v26 = vld [vmem:[%s890_s2] ss:$0 sm:$0xff]  ;;  %v597_v37 = vld [vmem:[#allocation8 + $0x38] sm:$0xff]  }
  0x53   :  { %v596_v36 = vld [vmem:[#allocation8 + $0x30] sm:$0xff]  }
  0x54   :  { %v458_v38 = vld [vmem:[%s892_s4] ss:$0 sm:$0xff]  ;;  %s686_s4 = scalar_lea.vmem %s436_s10, 256 }
  0x55   :  { %508 = vmatpush3.bf16.msra.mxu0 %v576_v3  ;;  %528 = vmatpush3.bf16.msra.mxu1 %v584_v8  ;;  %v467_v48 = vld [vmem:[%s894_s6] ss:$0 sm:$0xff]  ;;  %p687_p4 = scmp.ne.s32.totalorder %s436_s10, %s686_s4  ;;  %p692_p6 = scmp.lt.s32.totalorder %s686_s4, %s686_s4 }
  0x56   :  { %509 = vmatprep.subr.bf16.mxu0 %v724_v0  ;;  %529 = vmatprep.subr.bf16.mxu1 %v724_v0 }
  0x57   :  { %p693_p7 = por %p692_p6, %p691_p5 }
  0x59   :  { %510 = vmatpush3.bf16.msra.mxu0 %v577_v5  ;;  %530 = vmatpush3.bf16.msra.mxu1 %v585_v10  ;;  %p694_p8 = pnand %p693_p7, %p687_p4 }
  0x5a   :  { %511 = vmatprep.subr.bf16.mxu0 %v724_v0  ;;  %531 = vmatprep.subr.bf16.mxu1 %v724_v0 }
  0x5d   :  { %512 = vmatpush3.bf16.msra.mxu0 %v578_v7  ;;  %532 = vmatpush3.bf16.msra.mxu1 %v586_v12 }
  0x5e   :  { %513 = vmatprep.subr.bf16.mxu0 %v724_v0  ;;  %533 = vmatprep.subr.bf16.mxu1 %v724_v0 }
  0x61   :  { %514 = vmatpush3.bf16.msra.mxu0 %v579_v9  ;;  %534 = vmatpush3.bf16.msra.mxu1 %v587_v16 }
  0x62   :  { %515 = vmatprep.subr.bf16.mxu0 %v724_v0  ;;  %535 = vmatprep.subr.bf16.mxu1 %v724_v0 }
  0x65   :  { %516 = vmatpush3.bf16.msra.mxu0 %v580_v11  ;;  %536 = vmatpush3.bf16.msra.mxu1 %v588_v18 }
  0x66   :  { %517 = vmatprep.subr.bf16.mxu0 %v724_v0  ;;  %537 = vmatprep.subr.bf16.mxu1 %v724_v0 }
  0x69   :  { %518 = vmatpush3.bf16.msra.mxu0 %v581_v13  ;;  %538 = vmatpush3.bf16.msra.mxu1 %v589_v19 }
  0x6a   :  { %543 = vmatprep.subr.bf16.mxu0 %v724_v0 }
  0x6c   :  { %520 = vmatmul.mubr.bf16.vlgmr.msra.gmra.mrb[0].mxu0 %v85_v17 }
  0x6d   :  { %559 = vmatprep.mubr.msk.bf16.mxu0 %vm725_vm0, %v724_v0  ;;  %544 = vmatpush3.bf16.msra.mxu0 %v590_v20 }
  0x6e   :  { %545 = vmatprep.subr.bf16.mxu0 %v724_v0 }
  0x71   :  { %546 = vmatpush3.bf16.msra.mxu0 %v591_v21 }
  0x72   :  { %547 = vmatprep.subr.bf16.mxu0 %v724_v0 }
  0x75   :  { %548 = vmatpush3.bf16.msra.mxu0 %v592_v22 }
  0x76   :  { %549 = vmatprep.subr.bf16.mxu0 %v724_v0 }
  0x79   :  { %550 = vmatpush3.bf16.msra.mxu0 %v593_v23 }
  0x7a   :  { %551 = vmatprep.subr.bf16.mxu0 %v724_v0 }
  0x7d   :  { %552 = vmatpush3.bf16.msra.mxu0 %v594_v24 }
  0x7e   :  { %553 = vmatprep.subr.bf16.mxu0 %v724_v0 }
  0x81   :  { %554 = vmatpush3.bf16.msra.mxu0 %v595_v25 }
  0x82   :  { %555 = vmatprep.subr.bf16.mxu0 %v724_v0 }
  0x85   :  { %556 = vmatpush3.bf16.msra.mxu0 %v596_v36 }
  0x86   :  { %557 = vmatprep.subr.bf16.mxu0 %v724_v0 }
  0x89   :  { %558 = vmatpush3.bf16.msra.mxu0 %v597_v37 }
 0x13f   :  { %v191_v27 = vpop.f32.mrb[0].mxu0 }
 0x140   :  { %v192_v28 = vadd.f32 %v449_v26, %v191_v27  ;;  %v521_v29 = vpop.f32.mrb[1].mxu0 }
 0x141   :  { %v194_v30 = vpop.f32.mrb[2].mxu0 }
 0x142   :  { %v195_v31 = vadd.f32 %v449_v26, %v194_v30  ;;  %v522_v32 = vpop.f32.mrb[3].mxu0  ;;  %v198_v33 = vmax.f32 %v192_v28, 0.0 }
 0x144   :  { %v199_v34 = vmax.f32 %v195_v31, 0.0 }
 0x146   :  { %v200_v35 = vpack.c.bf16 %v199_v34, %v198_v33 }
 0x148   :  { %540 = vmatmul.mubr.bf16.vlgmr.msra.gmra.mrb[0].mxu1 %v200_v35 }
 0x21b   :  { %v306_v39 = vpop.f32.mrb[0].mxu1 }
 0x21c   :  { %v307_v40 = vadd.f32 %v458_v38, %v306_v39  ;;  %v541_v41 = vpop.f32.mrb[1].mxu1 }
 0x21d   :  { %v309_v42 = vpop.f32.mrb[2].mxu1 }
 0x21e   :  { %v310_v43 = vadd.f32 %v458_v38, %v309_v42  ;;  %v542_v44 = vpop.f32.mrb[3].mxu1  ;;  %v313_v45 = vmax.f32 %v307_v40, 0.0 }
 0x220   :  { %v314_v46 = vmax.f32 %v310_v43, 0.0 }
 0x222   :  { %v315_v47 = vpack.c.bf16 %v314_v46, %v313_v45 }
 0x224   :  { %560 = vmatmul.mubr.bf16.vlgmr.msra.gmra.mrb[4].mxu0 %v315_v47 }
 0x2f7   :  { %v421_v49 = vpop.f32.mrb[4].mxu0 }
 0x2f8   :  { %v422_v50 = vadd.f32 %v467_v48, %v421_v49  ;;  %v561_v51 = vpop.f32.mrb[5].mxu0 }
 0x2f9   :  { %v424_v52 = vpop.f32.mrb[6].mxu0 }
 0x2fa   :  { %428 = vst [vmem:[#allocation10] sm:$0xff] %v422_v50  ;;  %v425_v53 = vadd.f32 %v467_v48, %v424_v52  ;;  %v562_v54 = vpop.f32.mrb[7].mxu0 }
 0x2fc   :  { %429 = vst [vmem:[#allocation10 + $0x8] sm:$0xff] %v425_v53 }
 0x2fd   :  { %697 = shalt.err (!%p694_p8)
}
 0x2fe   :  { %s698_s14 = scalar_lea.hbm %s895_s7, 256 }
 0x2ff   :  { %p699_p9 = scmp.ne.s32.totalorder %s895_s7, %s698_s14  ;;  %p702_p10 = scmp.lt.u32.totalorder %s698_s14, %s895_s7 }
 0x301   :  { %p704_p11 = pnand %p702_p10, %p699_p9 }
 0x303   :  { %707 = shalt.err (!%p704_p11)
}
 0x304   :  { %441 = dma.vmem_to_hbm [thread:$0]  %s436_s10, 256, %s895_s7, [#allocation4], %s720_s1, %s720_s1, %s721_s25  }
 0x305   :  { %714 = dma.done.wait [#allocation4], 256  }
 0x306   :  { %715 = vsyncadd [#allocation4], 4294967040 }
 0x307   :  { %445 = vsyncpa [#allocation3], 1 }
 0x308   :  { %446 = vsyncpa [#allocation6], 1 }
 0x309   :  { %447 = vsyncpa [#allocation9], 1 }
 0x30a   :  { %448 = vsyncpa [#allocation4], 1 }

// kernel: tpu_custom_call.1
= control target key start
LH: loop header
LB: loop body
LE: loop exit
PB: predicated region body
PF: predicated region fallthrough
CT: control target
= control target key end

     0   :  { %8 = vsyncpa [#allocation4], 0  ;;  %s418_s0 = inlined_call_operand.hbm [shape: f32[16,128], index: 0, kind: input, shape index: {}]   ;;  %s419_s1 = inlined_call_operand.hbm [shape: bf16[128,128], index: 1, kind: input, shape index: {}]   ;;  %s420_s2 = inlined_call_operand.vmem [shape: f32[1,128], index: 2, kind: input, shape index: {}]   ;;  %s421_s3 = inlined_call_operand.hbm [shape: bf16[16,128], index: 3, kind: output, shape index: {}]  }
   0x1   :  { %9 = vsyncpa [#allocation7], 0 }
   0x2   :  { %10 = vsyncpa [#allocation5], 0  ;;  %s344_s12 = smov [#allocation3]   ;;  %s272_s16 = scalar_lea.hbm %s418_s0, 256 }
   0x3   :  { %s16_s13 = sshll.u32 %s344_s12, 4  ;;  %p273_p0 = scmp.ne.s32.totalorder %s418_s0, %s272_s16  ;;  %s17_s13 = int_to_ptr.vmem [resolvable:$true] %s16_s13 }
   0x4   :  { %p276_p1 = scmp.lt.u32.totalorder %s272_s16, %s418_s0 }
   0x6   :  { %p278_p2 = pnand %p276_p1, %p273_p0 }
   0x8   :  { %281 = shalt.err (!%p278_p2)
}
   0x9   :  { %s282_s21 = scalar_lea.vmem %s17_s13, 256  ;;  %p287_p4 = scmp.lt.s32.totalorder %s17_s13, %s17_s13 }
   0xa   :  { %p283_p3 = scmp.ne.s32.totalorder %s17_s13, %s282_s21  ;;  %p288_p5 = scmp.lt.s32.totalorder %s282_s21, %s282_s21 }
   0xc   :  { %p289_p6 = por %p288_p5, %p287_p4 }
   0xe   :  { %p290_p7 = pnand %p289_p6, %p283_p3 }
  0x10   :  { %293 = shalt.err (!%p290_p7)
}
  0x11   :  { %s345_s22 = smov 128   ;;  %s346_s23 = smov 8  }
  0x12   :  { %22 = dma.hbm_to_vmem [thread:$0]  %s418_s0, 256, %s17_s13, [#allocation4], %s345_s22, %s345_s22, %s346_s23  }
  0x13   :  { %s347_s26 = smov [#allocation6]   ;;  %s294_s30 = scalar_lea.hbm %s419_s1, 1024 }
  0x14   :  { %s28_s27 = sshll.u32 %s347_s26, 4  ;;  %p295_p8 = scmp.ne.s32.totalorder %s419_s1, %s294_s30  ;;  %s29_s27 = int_to_ptr.vmem [resolvable:$true] %s28_s27 }
  0x15   :  { %p298_p9 = scmp.lt.u32.totalorder %s294_s30, %s419_s1 }
  0x17   :  { %p300_p10 = pnand %p298_p9, %p295_p8 }
  0x19   :  { %303 = shalt.err (!%p300_p10)
}
  0x1a   :  { %s304_s8 = scalar_lea.vmem %s29_s27, 1024  ;;  %p309_p12 = scmp.lt.s32.totalorder %s29_s27, %s29_s27 }
  0x1b   :  { %p305_p11 = scmp.ne.s32.totalorder %s29_s27, %s304_s8  ;;  %p310_p13 = scmp.lt.s32.totalorder %s304_s8, %s304_s8 }
  0x1d   :  { %p311_p0 = por %p310_p13, %p309_p12 }
  0x1f   :  { %p312_p1 = pnand %p311_p0, %p305_p11 }
  0x21   :  { %315 = shalt.err (!%p312_p1)
}
  0x22   :  { %s348_s0 = smov 64   ;;  %s349_s9 = smov 4  }
  0x23   :  { %34 = dma.hbm_to_vmem [thread:$0]  %s419_s1, 1024, %s29_s27, [#allocation7], %s348_s0, %s348_s0, %s349_s9  }
  0x24   :  { %338 = dma.done.wait [#allocation4], 256  }
  0x25   :  { %339 = vsyncadd [#allocation4], 4294967040 }
  0x26   :  { %340 = dma.done.wait [#allocation7], 1024  }
  0x27   :  { %341 = vsyncadd [#allocation7], 4294966272  ;;  %v350_v0 = vmov 0.0   ;;  %vm351_vm0 = vmmov 0   ;;  %v264_v1 = vld [vmem:[#allocation6] sm:$0xff]   ;;  %v265_v2 = vld [vmem:[#allocation6 + $0x8] sm:$0xff]  }
  0x28   :  { %235 = vmatprep.subr.bf16.mxu0 %v350_v0  ;;  %251 = vmatprep.mubr.msk.bf16.mxu0 %vm351_vm0, %v350_v0  ;;  %v266_v3 = vld [vmem:[#allocation6 + $0x10] sm:$0xff]   ;;  %v267_v4 = vld [vmem:[#allocation6 + $0x18] sm:$0xff]   ;;  %v268_v5 = vld [vmem:[#allocation6 + $0x20] sm:$0xff]   ;;  %s352_s13 = smov [#allocation8]  }
  0x29   :  { %236 = vmatpush3.bf16.msra.mxu0 %v264_v1  ;;  %v269_v6 = vld [vmem:[#allocation6 + $0x28] sm:$0xff]   ;;  %v270_v7 = vld [vmem:[#allocation6 + $0x30] sm:$0xff]   ;;  %v271_v8 = vld [vmem:[#allocation6 + $0x38] sm:$0xff]   ;;  %s195_s14 = sshll.u32 %s352_s13, 4  ;;  %s196_s14 = int_to_ptr.vmem [resolvable:$true] %s195_s14 }
  0x2a   :  { %237 = vmatprep.subr.bf16.mxu0 %v350_v0  ;;  %v52_v9 = vld [vmem:[#allocation3] sm:$0xff]  ;;  %v53_v10 = vld [vmem:[#allocation3 + $0x8] sm:$0xff]  ;;  %s316_s15 = scalar_lea.vmem %s196_s14, 128  ;;  %p321_p3 = scmp.lt.s32.totalorder %s196_s14, %s196_s14 }
  0x2b   :  { %v54_v11 = vpack.c.bf16 %v53_v10, %v52_v9  ;;  %v216_v12 = vld [vmem:[%s420_s2] ss:$0 sm:$0xff]  ;;  %p317_p2 = scmp.ne.s32.totalorder %s196_s14, %s316_s15  ;;  %p322_p4 = scmp.lt.s32.totalorder %s316_s15, %s316_s15 }
  0x2d   :  { %238 = vmatpush3.bf16.msra.mxu0 %v265_v2  ;;  %p323_p5 = por %p322_p4, %p321_p3 }
  0x2e   :  { %239 = vmatprep.subr.bf16.mxu0 %v350_v0 }
  0x2f   :  { %p324_p6 = pnand %p323_p5, %p317_p2 }
  0x31   :  { %240 = vmatpush3.bf16.msra.mxu0 %v266_v3 }
  0x32   :  { %241 = vmatprep.subr.bf16.mxu0 %v350_v0 }
  0x35   :  { %242 = vmatpush3.bf16.msra.mxu0 %v267_v4 }
  0x36   :  { %243 = vmatprep.subr.bf16.mxu0 %v350_v0 }
  0x39   :  { %244 = vmatpush3.bf16.msra.mxu0 %v268_v5 }
  0x3a   :  { %245 = vmatprep.subr.bf16.mxu0 %v350_v0 }
  0x3d   :  { %246 = vmatpush3.bf16.msra.mxu0 %v269_v6 }
  0x3e   :  { %247 = vmatprep.subr.bf16.mxu0 %v350_v0 }
  0x41   :  { %248 = vmatpush3.bf16.msra.mxu0 %v270_v7 }
  0x42   :  { %249 = vmatprep.subr.bf16.mxu0 %v350_v0 }
  0x45   :  { %250 = vmatpush3.bf16.msra.mxu0 %v271_v8 }
  0x48   :  { %252 = vmatmul.mubr.bf16.vlgmr.msra.gmra.mrb[0].mxu0 %v54_v11 }
 0x11b   :  { %v153_v13 = vpop.f32.mrb[0].mxu0 }
 0x11c   :  { %v176_v14 = vadd.f32 %v216_v12, %v153_v13  ;;  %v253_v15 = vpop.f32.mrb[1].mxu0 }
 0x11d   :  { %v156_v16 = vpop.f32.mrb[2].mxu0 }
 0x11e   :  { %v177_v17 = vadd.f32 %v216_v12, %v156_v16  ;;  %v254_v18 = vpop.f32.mrb[3].mxu0  ;;  %v178_v19 = vmax.f32 %v176_v14, 0.0 }
 0x120   :  { %v179_v20 = vmax.f32 %v177_v17, 0.0 }
 0x122   :  { %v224_v21 = vpack.c.bf16 %v179_v20, %v178_v19 }
 0x124   :  { %225 = vst [vmem:[#allocation8] sm:$0xff] %v224_v21  }
 0x125   :  { %327 = shalt.err (!%p324_p6)
}
 0x126   :  { %s328_s17 = scalar_lea.hbm %s421_s3, 128 }
 0x127   :  { %p329_p7 = scmp.ne.s32.totalorder %s421_s3, %s328_s17  ;;  %p332_p8 = scmp.lt.u32.totalorder %s328_s17, %s421_s3 }
 0x129   :  { %p334_p9 = pnand %p332_p8, %p329_p7 }
 0x12b   :  { %337 = shalt.err (!%p334_p9)
}
 0x12c   :  { %201 = dma.vmem_to_hbm [thread:$0]  %s196_s14, 128, %s421_s3, [#allocation5], %s348_s0, %s348_s0, %s349_s9  }
 0x12d   :  { %342 = dma.done.wait [#allocation5], 128  }
 0x12e   :  { %343 = vsyncadd [#allocation5], 4294967168 }
 0x12f   :  { %205 = vsyncpa [#allocation4], 1 }
 0x130   :  { %206 = vsyncpa [#allocation7], 1 }
 0x131   :  { %207 = vsyncpa [#allocation5], 1 }

</bundles_post_ra>
